<compile_context>
chip_gen: v5e
topology: v5e:2x2
jax: 0.10.0
libtpu: 0.0.40
codegen_flags: <defaults>
</compile_context>

<pallas_src>
import jax
import jax.numpy as jnp
from jax.experimental import pallas as pl
from jax.experimental.pallas import tpu as pltpu
import numpy as np

CHANNEL = 10  # channel_size in the torch module


def _elu(x):
    # ELU(alpha=1): x if x > 0 else exp(x) - 1   (min() keeps exp() finite everywhere)
    return jnp.where(x > 0, x, jnp.exp(jnp.minimum(x, 0.0)) - 1.0)


def _round_up(x, m):
    return (x + m - 1) // m * m


def _make_kernel(T, D, O, B_tile):
    C1, C2, C3 = 3 * CHANNEL, 2 * CHANNEL, CHANNEL
    K1, K2 = 6, 4
    L1 = T // 2 - 2
    L2 = T // 4 - 2
    Bt = B_tile

    def kernel(x_ref, w1_ref, b1_ref, wc1_ref, bc1_ref, wc2_ref, bc2_ref,
               w3_ref, b3_ref, out_ref):
        # --- channel_regular_encoder: Linear(D, 3*ch) + ELU over all T*Bt rows ------
        x = x_ref[...].reshape(T * Bt, D)                         # time-major rows
        h1 = _elu(jnp.dot(x, w1_ref[...],
                          preferred_element_type=jnp.float32) + b1_ref[...])

        # --- Conv1d(3*ch -> 2*ch, k=6, stride=2) + ELU: even/odd split + tap matmuls
        h1r = h1.reshape(T // 2, 2, Bt, C1)                       # leading-dim split
        ev1 = h1r[:, 0]                                           # (T//2, Bt, C1)
        od1 = h1r[:, 1]
        acc1 = jnp.dot(ev1[0:L1].reshape(L1 * Bt, C1), wc1_ref[0],
                       preferred_element_type=jnp.float32)
        acc1 = acc1 + jnp.dot(od1[0:L1].reshape(L1 * Bt, C1), wc1_ref[1],
                              preferred_element_type=jnp.float32)
        for j in range(1, K1 // 2):
            acc1 = acc1 + jnp.dot(ev1[j:j + L1].reshape(L1 * Bt, C1), wc1_ref[2 * j],
                                  preferred_element_type=jnp.float32)
            acc1 = acc1 + jnp.dot(od1[j:j + L1].reshape(L1 * Bt, C1), wc1_ref[2 * j + 1],
                                  preferred_element_type=jnp.float32)
        h2 = _elu(acc1 + bc1_ref[...])                            # (L1*Bt, C2)

        # --- Conv1d(2*ch -> ch, k=4, stride=2) + ELU ---------------------------------
        h2r = h2.reshape(L1 // 2, 2, Bt, C2)
        ev2 = h2r[:, 0]
        od2 = h2r[:, 1]
        acc2 = jnp.dot(ev2[0:L2].reshape(L2 * Bt, C2), wc2_ref[0],
                       preferred_element_type=jnp.float32)
        acc2 = acc2 + jnp.dot(od2[0:L2].reshape(L2 * Bt, C2), wc2_ref[1],
                              preferred_element_type=jnp.float32)
        for j in range(1, K2 // 2):
            acc2 = acc2 + jnp.dot(ev2[j:j + L2].reshape(L2 * Bt, C2), wc2_ref[2 * j],
                                  preferred_element_type=jnp.float32)
            acc2 = acc2 + jnp.dot(od2[j:j + L2].reshape(L2 * Bt, C2), wc2_ref[2 * j + 1],
                                  preferred_element_type=jnp.float32)
        h3 = _elu(acc2 + bc2_ref[...]).reshape(L2, Bt, C3)        # (L2, Bt, C3)

        # --- Flatten (channel-major; folded into w3 layout) + Linear, M = Bt ---------
        out = jnp.dot(h3[0], w3_ref[0], preferred_element_type=jnp.float32)
        for l in range(1, L2):
            out = out + jnp.dot(h3[l], w3_ref[l],
                                preferred_element_type=jnp.float32)
        out_ref[...] = (out + b3_ref[...]).astype(out_ref.dtype)  # (Bt, O)

    return kernel


def init_params(key, T, D, O):
    C1, C2, C3 = 3 * CHANNEL, 2 * CHANNEL, CHANNEL
    K1, K2 = 6, 4
    L2 = T // 4 - 2
    ks = jax.random.split(key, 8)
    s = 0.1
    return dict(
        W1=s * jax.random.normal(ks[0], (C1, D), jnp.float32),
        b1=s * jax.random.normal(ks[1], (C1,), jnp.float32),
        Wc1=s * jax.random.normal(ks[2], (C2, C1, K1), jnp.float32),
        bc1=s * jax.random.normal(ks[3], (C2,), jnp.float32),
        Wc2=s * jax.random.normal(ks[4], (C3, C2, K2), jnp.float32),
        bc2=s * jax.random.normal(ks[5], (C3,), jnp.float32),
        W3=s * jax.random.normal(ks[6], (O, C3 * L2), jnp.float32),
        b3=s * jax.random.normal(ks[7], (O,), jnp.float32),
    )


def obs_history_encoder_pallas(obs_history, params, T, D, O, b_tile=256):
    if T % 4 != 0:
        raise ValueError("obs_history_len must be divisible by 4")
    if T < 12:
        raise ValueError("obs_history_len must be >= 12 (conv stack needs L2 >= 1)")
    B = obs_history.shape[0]
    C1, C2, C3 = 3 * CHANNEL, 2 * CHANNEL, CHANNEL
    K1, K2 = 6, 4
    L2 = T // 4 - 2

    # batch tile: multiple of 8 (sublane-aligned), capped (VMEM-friendly on v7x 64 MiB).
    B_tile = _round_up(min(b_tile, _round_up(B, 8)), 8)
    B_pad = _round_up(B, B_tile)

    # ---- glue: time-major input + kernel-friendly weight layouts (plain JAX) ----
    x = obs_history.reshape(B, T, D).astype(jnp.float32)
    x = jnp.transpose(x, (1, 0, 2))                        # (T, B, D) time-major
    if B_pad > B:
        x = jnp.pad(x, ((0, 0), (0, B_pad - B), (0, 0)))

    w1t = params['W1'].T                                   # (D, C1)
    b1 = params['b1'].reshape(1, C1)
    wc1 = jnp.transpose(params['Wc1'], (2, 1, 0))          # (K1, C1, C2)
    bc1 = params['bc1'].reshape(1, C2)
    wc2 = jnp.transpose(params['Wc2'], (2, 1, 0))          # (K2, C2, C3)
    bc2 = params['bc2'].reshape(1, C3)
    # torch Flatten of (C3, L2) is channel-major: fold that ordering into w3
    w3 = jnp.transpose(params['W3'].reshape(O, C3, L2), (2, 1, 0))   # (L2, C3, O)
    b3 = params['b3'].reshape(1, O)

    kernel = _make_kernel(T, D, O, B_tile)

    out = pl.pallas_call(
        kernel,
        out_shape=jax.ShapeDtypeStruct((B_pad, O), jnp.float32),
        grid=(B_pad // B_tile,),
        in_specs=[
            pl.BlockSpec((T, B_tile, D), lambda i: (0, i, 0)),
            pl.BlockSpec((D, C1), lambda i: (0, 0)),
            pl.BlockSpec((1, C1), lambda i: (0, 0)),
            pl.BlockSpec((K1, C1, C2), lambda i: (0, 0, 0)),
            pl.BlockSpec((1, C2), lambda i: (0, 0)),
            pl.BlockSpec((K2, C2, C3), lambda i: (0, 0, 0)),
            pl.BlockSpec((1, C3), lambda i: (0, 0)),
            pl.BlockSpec((L2, C3, O), lambda i: (0, 0, 0)),
            pl.BlockSpec((1, O), lambda i: (0, 0)),
        ],
        out_specs=pl.BlockSpec((B_tile, O), lambda i: (i, 0)),
        compiler_params=pltpu.CompilerParams(
            dimension_semantics=("parallel",),
            vmem_limit_bytes=32 * 1024 * 1024),
    )(x, w1t, b1, wc1, bc1, wc2, bc2, w3, b3)

    return out[:B]


# ------------------------- pure-JAX reference (no conv primitive) -------------------
def _conv1d_ncl_ref(x, w, b, stride):
    """x: (B, Cin, L), w: (Cout, Cin, K), VALID, given stride — matches torch Conv1d."""
    K = w.shape[2]
    Lout = (x.shape[2] - K) // stride + 1
    cols = [jnp.einsum('bck,ock->bo', x[:, :, l * stride:l * stride + K], w)
            for l in range(Lout)]
    return jnp.stack(cols, axis=-1) + b[None, :, None]


def obs_history_encoder_ref(obs_history, params, T, D, O):
    """Pure-JAX replica of the PyTorch forward (NCL conv convention)."""
    B = obs_history.shape[0]
    C1 = 3 * CHANNEL
    h = _elu(obs_history.reshape(-1, D) @ params['W1'].T + params['b1'])
    xc = jnp.transpose(h.reshape(B, T, C1), (0, 2, 1))      # (B, C1, T)
    y = _elu(_conv1d_ncl_ref(xc, params['Wc1'], params['bc1'], 2))
    y = _elu(_conv1d_ncl_ref(y, params['Wc2'], params['bc2'], 2))
    flat = y.reshape(B, -1)                                  # channel-major flatten
    return flat @ params['W3'].T + params['b3']


if __name__ == "__main__":
    key = jax.random.PRNGKey(0)

    # Case 1: spec-sized example (obs_history_len=16, obs_dim=12, output_dim=16).
    B, T, D, O = 2, 16, 12, 16
    k_obs, k_par, key = jax.random.split(key, 3)
    obs_history = jax.random.normal(k_obs, (B, T * D), jnp.float32)
    params = init_params(k_par, T, D, O)
    out = jax.block_until_ready(obs_history_encoder_pallas(obs_history, params, T, D, O))
    ref = obs_history_encoder_ref(obs_history, params, T, D, O)
    np.testing.assert_allclose(np.asarray(out), np.asarray(ref), rtol=1e-4, atol=1e-4)

    # Case 2: exercises multi-step grid + batch padding (B not a multiple of the tile).
    B, T, D, O = 20, 12, 7, 16
    k_obs, k_par, key = jax.random.split(key, 3)
    obs_history = jax.random.normal(k_obs, (B, T * D), jnp.float32)
    params = init_params(k_par, T, D, O)
    out = jax.block_until_ready(
        obs_history_encoder_pallas(obs_history, params, T, D, O, b_tile=8))
    ref = obs_history_encoder_ref(obs_history, params, T, D, O)
    np.testing.assert_allclose(np.asarray(out), np.asarray(ref), rtol=1e-4, atol=1e-4)

    print("KERNEL_OK")
</pallas_src>

<mosaic_0001>
module attributes {stable_mosaic.version = 11 : i64} {
  func.func @kernel(%arg0: i32, %arg1: memref<16x8x12xf32, #tpu.memory_space<vmem>>, %arg2: memref<12x30xf32, #tpu.memory_space<vmem>>, %arg3: memref<1x30xf32, #tpu.memory_space<vmem>>, %arg4: memref<6x30x20xf32, #tpu.memory_space<vmem>>, %arg5: memref<1x20xf32, #tpu.memory_space<vmem>>, %arg6: memref<4x20x10xf32, #tpu.memory_space<vmem>>, %arg7: memref<1x10xf32, #tpu.memory_space<vmem>>, %arg8: memref<2x10x16xf32, #tpu.memory_space<vmem>>, %arg9: memref<1x16xf32, #tpu.memory_space<vmem>>, %arg10: memref<8x16xf32, #tpu.memory_space<vmem>>) attributes {dimension_semantics = [#tpu.dimension_semantics<parallel>], iteration_bounds = array<i64: 1>, scalar_prefetch = 0 : i64, scratch_operands = 0 : i64, tpu.core_type = #tpu.core_type<tc>, window_params = [{transform_indices = @transform_0, window_bounds = array<i64: 16, 8, 12>}, {pipeline_mode = #tpu.pipeline_mode<synchronous>, transform_indices = @transform_1, window_bounds = array<i64: 12, 30>}, {pipeline_mode = #tpu.pipeline_mode<synchronous>, transform_indices = @transform_2, window_bounds = array<i64: 1, 30>}, {pipeline_mode = #tpu.pipeline_mode<synchronous>, transform_indices = @transform_3, window_bounds = array<i64: 6, 30, 20>}, {pipeline_mode = #tpu.pipeline_mode<synchronous>, transform_indices = @transform_4, window_bounds = array<i64: 1, 20>}, {pipeline_mode = #tpu.pipeline_mode<synchronous>, transform_indices = @transform_5, window_bounds = array<i64: 4, 20, 10>}, {pipeline_mode = #tpu.pipeline_mode<synchronous>, transform_indices = @transform_6, window_bounds = array<i64: 1, 10>}, {pipeline_mode = #tpu.pipeline_mode<synchronous>, transform_indices = @transform_7, window_bounds = array<i64: 2, 10, 16>}, {pipeline_mode = #tpu.pipeline_mode<synchronous>, transform_indices = @transform_8, window_bounds = array<i64: 1, 16>}, {transform_indices = @transform_9, window_bounds = array<i64: 8, 16>}]} {
    %c0 = arith.constant 0 : index
    %c0_0 = arith.constant 0 : index
    %c0_1 = arith.constant 0 : index
    %0 = vector.load %arg1[%c0, %c0_0, %c0_1] : memref<16x8x12xf32, #tpu.memory_space<vmem>>, vector<16x8x12xf32>
    %1 = vector.shape_cast %0 : vector<16x8x12xf32> to vector<128x12xf32>
    %c0_2 = arith.constant 0 : index
    %c0_3 = arith.constant 0 : index
    %2 = vector.load %arg2[%c0_2, %c0_3] : memref<12x30xf32, #tpu.memory_space<vmem>>, vector<12x30xf32>
    %cst = arith.constant dense<0.000000e+00> : vector<128x30xf32>
    %3 = tpu.matmul %1, %2, %cst {dimension_numbers = #tpu.dot_dimension_numbers<[1], [0], [0], [1], [0, 0, 1, 1], [], []>} : vector<128x12xf32>, vector<12x30xf32>, vector<128x30xf32> -> vector<128x30xf32>
    %c0_4 = arith.constant 0 : index
    %c0_5 = arith.constant 0 : index
    %4 = vector.load %arg3[%c0_4, %c0_5] : memref<1x30xf32, #tpu.memory_space<vmem>>, vector<1x30xf32>
    %5 = vector.broadcast %4 : vector<1x30xf32> to vector<128x30xf32>
    %6 = arith.addf %3, %5 : vector<128x30xf32>
    %cst_6 = arith.constant 0.000000e+00 : f32
    %7 = vector.broadcast %cst_6 : f32 to vector<128x30xf32>
    %8 = arith.cmpf ogt, %6, %7 : vector<128x30xf32>
    %cst_7 = arith.constant 0.000000e+00 : f32
    %9 = vector.broadcast %cst_7 : f32 to vector<128x30xf32>
    %10 = arith.minimumf %6, %9 : vector<128x30xf32>
    %11 = math.exp %10 : vector<128x30xf32>
    %cst_8 = arith.constant 1.000000e+00 : f32
    %12 = vector.broadcast %cst_8 : f32 to vector<128x30xf32>
    %13 = arith.subf %11, %12 : vector<128x30xf32>
    %14 = arith.select %8, %6, %13 : vector<128x30xi1>, vector<128x30xf32>
    %15 = vector.shape_cast %14 : vector<128x30xf32> to vector<8x2x8x30xf32>
    %16 = vector.extract_strided_slice %15 {offsets = [0, 0, 0, 0], sizes = [8, 1, 8, 30], strides = [1, 1, 1, 1]} : vector<8x2x8x30xf32> to vector<8x1x8x30xf32>
    %17 = vector.shape_cast %16 : vector<8x1x8x30xf32> to vector<8x8x30xf32>
    %18 = vector.extract_strided_slice %15 {offsets = [0, 1, 0, 0], sizes = [8, 1, 8, 30], strides = [1, 1, 1, 1]} : vector<8x2x8x30xf32> to vector<8x1x8x30xf32>
    %19 = vector.shape_cast %18 : vector<8x1x8x30xf32> to vector<8x8x30xf32>
    %20 = vector.extract_strided_slice %17 {offsets = [0, 0, 0], sizes = [6, 8, 30], strides = [1, 1, 1]} : vector<8x8x30xf32> to vector<6x8x30xf32>
    %21 = vector.shape_cast %20 : vector<6x8x30xf32> to vector<48x30xf32>
    %c0_9 = arith.constant 0 : index
    %c0_10 = arith.constant 0 : index
    %c0_11 = arith.constant 0 : index
    %22 = vector.load %arg4[%c0_9, %c0_10, %c0_11] : memref<6x30x20xf32, #tpu.memory_space<vmem>>, vector<1x30x20xf32>
    %23 = vector.shape_cast %22 : vector<1x30x20xf32> to vector<30x20xf32>
    %cst_12 = arith.constant dense<0.000000e+00> : vector<48x20xf32>
    %24 = tpu.matmul %21, %23, %cst_12 {dimension_numbers = #tpu.dot_dimension_numbers<[1], [0], [0], [1], [0, 0, 1, 1], [], []>} : vector<48x30xf32>, vector<30x20xf32>, vector<48x20xf32> -> vector<48x20xf32>
    %25 = vector.extract_strided_slice %19 {offsets = [0, 0, 0], sizes = [6, 8, 30], strides = [1, 1, 1]} : vector<8x8x30xf32> to vector<6x8x30xf32>
    %26 = vector.shape_cast %25 : vector<6x8x30xf32> to vector<48x30xf32>
    %c1 = arith.constant 1 : index
    %c0_13 = arith.constant 0 : index
    %c0_14 = arith.constant 0 : index
    %27 = vector.load %arg4[%c1, %c0_13, %c0_14] : memref<6x30x20xf32, #tpu.memory_space<vmem>>, vector<1x30x20xf32>
    %28 = vector.shape_cast %27 : vector<1x30x20xf32> to vector<30x20xf32>
    %cst_15 = arith.constant dense<0.000000e+00> : vector<48x20xf32>
    %29 = tpu.matmul %26, %28, %cst_15 {dimension_numbers = #tpu.dot_dimension_numbers<[1], [0], [0], [1], [0, 0, 1, 1], [], []>} : vector<48x30xf32>, vector<30x20xf32>, vector<48x20xf32> -> vector<48x20xf32>
    %30 = arith.addf %24, %29 : vector<48x20xf32>
    %31 = vector.extract_strided_slice %17 {offsets = [1, 0, 0], sizes = [6, 8, 30], strides = [1, 1, 1]} : vector<8x8x30xf32> to vector<6x8x30xf32>
    %32 = vector.shape_cast %31 : vector<6x8x30xf32> to vector<48x30xf32>
    %c2 = arith.constant 2 : index
    %c0_16 = arith.constant 0 : index
    %c0_17 = arith.constant 0 : index
    %33 = vector.load %arg4[%c2, %c0_16, %c0_17] : memref<6x30x20xf32, #tpu.memory_space<vmem>>, vector<1x30x20xf32>
    %34 = vector.shape_cast %33 : vector<1x30x20xf32> to vector<30x20xf32>
    %cst_18 = arith.constant dense<0.000000e+00> : vector<48x20xf32>
    %35 = tpu.matmul %32, %34, %cst_18 {dimension_numbers = #tpu.dot_dimension_numbers<[1], [0], [0], [1], [0, 0, 1, 1], [], []>} : vector<48x30xf32>, vector<30x20xf32>, vector<48x20xf32> -> vector<48x20xf32>
    %36 = arith.addf %30, %35 : vector<48x20xf32>
    %37 = vector.extract_strided_slice %19 {offsets = [1, 0, 0], sizes = [6, 8, 30], strides = [1, 1, 1]} : vector<8x8x30xf32> to vector<6x8x30xf32>
    %38 = vector.shape_cast %37 : vector<6x8x30xf32> to vector<48x30xf32>
    %c3 = arith.constant 3 : index
    %c0_19 = arith.constant 0 : index
    %c0_20 = arith.constant 0 : index
    %39 = vector.load %arg4[%c3, %c0_19, %c0_20] : memref<6x30x20xf32, #tpu.memory_space<vmem>>, vector<1x30x20xf32>
    %40 = vector.shape_cast %39 : vector<1x30x20xf32> to vector<30x20xf32>
    %cst_21 = arith.constant dense<0.000000e+00> : vector<48x20xf32>
    %41 = tpu.matmul %38, %40, %cst_21 {dimension_numbers = #tpu.dot_dimension_numbers<[1], [0], [0], [1], [0, 0, 1, 1], [], []>} : vector<48x30xf32>, vector<30x20xf32>, vector<48x20xf32> -> vector<48x20xf32>
    %42 = arith.addf %36, %41 : vector<48x20xf32>
    %43 = vector.extract_strided_slice %17 {offsets = [2, 0, 0], sizes = [6, 8, 30], strides = [1, 1, 1]} : vector<8x8x30xf32> to vector<6x8x30xf32>
    %44 = vector.shape_cast %43 : vector<6x8x30xf32> to vector<48x30xf32>
    %c4 = arith.constant 4 : index
    %c0_22 = arith.constant 0 : index
    %c0_23 = arith.constant 0 : index
    %45 = vector.load %arg4[%c4, %c0_22, %c0_23] : memref<6x30x20xf32, #tpu.memory_space<vmem>>, vector<1x30x20xf32>
    %46 = vector.shape_cast %45 : vector<1x30x20xf32> to vector<30x20xf32>
    %cst_24 = arith.constant dense<0.000000e+00> : vector<48x20xf32>
    %47 = tpu.matmul %44, %46, %cst_24 {dimension_numbers = #tpu.dot_dimension_numbers<[1], [0], [0], [1], [0, 0, 1, 1], [], []>} : vector<48x30xf32>, vector<30x20xf32>, vector<48x20xf32> -> vector<48x20xf32>
    %48 = arith.addf %42, %47 : vector<48x20xf32>
    %49 = vector.extract_strided_slice %19 {offsets = [2, 0, 0], sizes = [6, 8, 30], strides = [1, 1, 1]} : vector<8x8x30xf32> to vector<6x8x30xf32>
    %50 = vector.shape_cast %49 : vector<6x8x30xf32> to vector<48x30xf32>
    %c5 = arith.constant 5 : index
    %c0_25 = arith.constant 0 : index
    %c0_26 = arith.constant 0 : index
    %51 = vector.load %arg4[%c5, %c0_25, %c0_26] : memref<6x30x20xf32, #tpu.memory_space<vmem>>, vector<1x30x20xf32>
    %52 = vector.shape_cast %51 : vector<1x30x20xf32> to vector<30x20xf32>
    %cst_27 = arith.constant dense<0.000000e+00> : vector<48x20xf32>
    %53 = tpu.matmul %50, %52, %cst_27 {dimension_numbers = #tpu.dot_dimension_numbers<[1], [0], [0], [1], [0, 0, 1, 1], [], []>} : vector<48x30xf32>, vector<30x20xf32>, vector<48x20xf32> -> vector<48x20xf32>
    %54 = arith.addf %48, %53 : vector<48x20xf32>
    %c0_28 = arith.constant 0 : index
    %c0_29 = arith.constant 0 : index
    %55 = vector.load %arg5[%c0_28, %c0_29] : memref<1x20xf32, #tpu.memory_space<vmem>>, vector<1x20xf32>
    %56 = vector.broadcast %55 : vector<1x20xf32> to vector<48x20xf32>
    %57 = arith.addf %54, %56 : vector<48x20xf32>
    %cst_30 = arith.constant 0.000000e+00 : f32
    %58 = vector.broadcast %cst_30 : f32 to vector<48x20xf32>
    %59 = arith.cmpf ogt, %57, %58 : vector<48x20xf32>
    %cst_31 = arith.constant 0.000000e+00 : f32
    %60 = vector.broadcast %cst_31 : f32 to vector<48x20xf32>
    %61 = arith.minimumf %57, %60 : vector<48x20xf32>
    %62 = math.exp %61 : vector<48x20xf32>
    %cst_32 = arith.constant 1.000000e+00 : f32
    %63 = vector.broadcast %cst_32 : f32 to vector<48x20xf32>
    %64 = arith.subf %62, %63 : vector<48x20xf32>
    %65 = arith.select %59, %57, %64 : vector<48x20xi1>, vector<48x20xf32>
    %66 = vector.shape_cast %65 : vector<48x20xf32> to vector<3x2x8x20xf32>
    %67 = vector.extract_strided_slice %66 {offsets = [0, 0, 0, 0], sizes = [3, 1, 8, 20], strides = [1, 1, 1, 1]} : vector<3x2x8x20xf32> to vector<3x1x8x20xf32>
    %68 = vector.shape_cast %67 : vector<3x1x8x20xf32> to vector<3x8x20xf32>
    %69 = vector.extract_strided_slice %66 {offsets = [0, 1, 0, 0], sizes = [3, 1, 8, 20], strides = [1, 1, 1, 1]} : vector<3x2x8x20xf32> to vector<3x1x8x20xf32>
    %70 = vector.shape_cast %69 : vector<3x1x8x20xf32> to vector<3x8x20xf32>
    %71 = vector.extract_strided_slice %68 {offsets = [0, 0, 0], sizes = [2, 8, 20], strides = [1, 1, 1]} : vector<3x8x20xf32> to vector<2x8x20xf32>
    %72 = vector.shape_cast %71 : vector<2x8x20xf32> to vector<16x20xf32>
    %c0_33 = arith.constant 0 : index
    %c0_34 = arith.constant 0 : index
    %c0_35 = arith.constant 0 : index
    %73 = vector.load %arg6[%c0_33, %c0_34, %c0_35] : memref<4x20x10xf32, #tpu.memory_space<vmem>>, vector<1x20x10xf32>
    %74 = vector.shape_cast %73 : vector<1x20x10xf32> to vector<20x10xf32>
    %cst_36 = arith.constant dense<0.000000e+00> : vector<16x10xf32>
    %75 = tpu.matmul %72, %74, %cst_36 {dimension_numbers = #tpu.dot_dimension_numbers<[1], [0], [0], [1], [0, 0, 1, 1], [], []>} : vector<16x20xf32>, vector<20x10xf32>, vector<16x10xf32> -> vector<16x10xf32>
    %76 = vector.extract_strided_slice %70 {offsets = [0, 0, 0], sizes = [2, 8, 20], strides = [1, 1, 1]} : vector<3x8x20xf32> to vector<2x8x20xf32>
    %77 = vector.shape_cast %76 : vector<2x8x20xf32> to vector<16x20xf32>
    %c1_37 = arith.constant 1 : index
    %c0_38 = arith.constant 0 : index
    %c0_39 = arith.constant 0 : index
    %78 = vector.load %arg6[%c1_37, %c0_38, %c0_39] : memref<4x20x10xf32, #tpu.memory_space<vmem>>, vector<1x20x10xf32>
    %79 = vector.shape_cast %78 : vector<1x20x10xf32> to vector<20x10xf32>
    %cst_40 = arith.constant dense<0.000000e+00> : vector<16x10xf32>
    %80 = tpu.matmul %77, %79, %cst_40 {dimension_numbers = #tpu.dot_dimension_numbers<[1], [0], [0], [1], [0, 0, 1, 1], [], []>} : vector<16x20xf32>, vector<20x10xf32>, vector<16x10xf32> -> vector<16x10xf32>
    %81 = arith.addf %75, %80 : vector<16x10xf32>
    %82 = vector.extract_strided_slice %68 {offsets = [1, 0, 0], sizes = [2, 8, 20], strides = [1, 1, 1]} : vector<3x8x20xf32> to vector<2x8x20xf32>
    %83 = vector.shape_cast %82 : vector<2x8x20xf32> to vector<16x20xf32>
    %c2_41 = arith.constant 2 : index
    %c0_42 = arith.constant 0 : index
    %c0_43 = arith.constant 0 : index
    %84 = vector.load %arg6[%c2_41, %c0_42, %c0_43] : memref<4x20x10xf32, #tpu.memory_space<vmem>>, vector<1x20x10xf32>
    %85 = vector.shape_cast %84 : vector<1x20x10xf32> to vector<20x10xf32>
    %cst_44 = arith.constant dense<0.000000e+00> : vector<16x10xf32>
    %86 = tpu.matmul %83, %85, %cst_44 {dimension_numbers = #tpu.dot_dimension_numbers<[1], [0], [0], [1], [0, 0, 1, 1], [], []>} : vector<16x20xf32>, vector<20x10xf32>, vector<16x10xf32> -> vector<16x10xf32>
    %87 = arith.addf %81, %86 : vector<16x10xf32>
    %88 = vector.extract_strided_slice %70 {offsets = [1, 0, 0], sizes = [2, 8, 20], strides = [1, 1, 1]} : vector<3x8x20xf32> to vector<2x8x20xf32>
    %89 = vector.shape_cast %88 : vector<2x8x20xf32> to vector<16x20xf32>
    %c3_45 = arith.constant 3 : index
    %c0_46 = arith.constant 0 : index
    %c0_47 = arith.constant 0 : index
    %90 = vector.load %arg6[%c3_45, %c0_46, %c0_47] : memref<4x20x10xf32, #tpu.memory_space<vmem>>, vector<1x20x10xf32>
    %91 = vector.shape_cast %90 : vector<1x20x10xf32> to vector<20x10xf32>
    %cst_48 = arith.constant dense<0.000000e+00> : vector<16x10xf32>
    %92 = tpu.matmul %89, %91, %cst_48 {dimension_numbers = #tpu.dot_dimension_numbers<[1], [0], [0], [1], [0, 0, 1, 1], [], []>} : vector<16x20xf32>, vector<20x10xf32>, vector<16x10xf32> -> vector<16x10xf32>
    %93 = arith.addf %87, %92 : vector<16x10xf32>
    %c0_49 = arith.constant 0 : index
    %c0_50 = arith.constant 0 : index
    %94 = vector.load %arg7[%c0_49, %c0_50] : memref<1x10xf32, #tpu.memory_space<vmem>>, vector<1x10xf32>
    %95 = vector.broadcast %94 : vector<1x10xf32> to vector<16x10xf32>
    %96 = arith.addf %93, %95 : vector<16x10xf32>
    %cst_51 = arith.constant 0.000000e+00 : f32
    %97 = vector.broadcast %cst_51 : f32 to vector<16x10xf32>
    %98 = arith.cmpf ogt, %96, %97 : vector<16x10xf32>
    %cst_52 = arith.constant 0.000000e+00 : f32
    %99 = vector.broadcast %cst_52 : f32 to vector<16x10xf32>
    %100 = arith.minimumf %96, %99 : vector<16x10xf32>
    %101 = math.exp %100 : vector<16x10xf32>
    %cst_53 = arith.constant 1.000000e+00 : f32
    %102 = vector.broadcast %cst_53 : f32 to vector<16x10xf32>
    %103 = arith.subf %101, %102 : vector<16x10xf32>
    %104 = arith.select %98, %96, %103 : vector<16x10xi1>, vector<16x10xf32>
    %105 = vector.shape_cast %104 : vector<16x10xf32> to vector<2x8x10xf32>
    %106 = vector.extract_strided_slice %105 {offsets = [0, 0, 0], sizes = [1, 8, 10], strides = [1, 1, 1]} : vector<2x8x10xf32> to vector<1x8x10xf32>
    %107 = vector.shape_cast %106 : vector<1x8x10xf32> to vector<8x10xf32>
    %c0_54 = arith.constant 0 : index
    %c0_55 = arith.constant 0 : index
    %c0_56 = arith.constant 0 : index
    %108 = vector.load %arg8[%c0_54, %c0_55, %c0_56] : memref<2x10x16xf32, #tpu.memory_space<vmem>>, vector<1x10x16xf32>
    %109 = vector.shape_cast %108 : vector<1x10x16xf32> to vector<10x16xf32>
    %cst_57 = arith.constant dense<0.000000e+00> : vector<8x16xf32>
    %110 = tpu.matmul %107, %109, %cst_57 {dimension_numbers = #tpu.dot_dimension_numbers<[1], [0], [0], [1], [0, 0, 1, 1], [], []>} : vector<8x10xf32>, vector<10x16xf32>, vector<8x16xf32> -> vector<8x16xf32>
    %111 = vector.extract_strided_slice %105 {offsets = [1, 0, 0], sizes = [1, 8, 10], strides = [1, 1, 1]} : vector<2x8x10xf32> to vector<1x8x10xf32>
    %112 = vector.shape_cast %111 : vector<1x8x10xf32> to vector<8x10xf32>
    %c1_58 = arith.constant 1 : index
    %c0_59 = arith.constant 0 : index
    %c0_60 = arith.constant 0 : index
    %113 = vector.load %arg8[%c1_58, %c0_59, %c0_60] : memref<2x10x16xf32, #tpu.memory_space<vmem>>, vector<1x10x16xf32>
    %114 = vector.shape_cast %113 : vector<1x10x16xf32> to vector<10x16xf32>
    %cst_61 = arith.constant dense<0.000000e+00> : vector<8x16xf32>
    %115 = tpu.matmul %112, %114, %cst_61 {dimension_numbers = #tpu.dot_dimension_numbers<[1], [0], [0], [1], [0, 0, 1, 1], [], []>} : vector<8x10xf32>, vector<10x16xf32>, vector<8x16xf32> -> vector<8x16xf32>
    %116 = arith.addf %110, %115 : vector<8x16xf32>
    %c0_62 = arith.constant 0 : index
    %c0_63 = arith.constant 0 : index
    %117 = vector.load %arg9[%c0_62, %c0_63] : memref<1x16xf32, #tpu.memory_space<vmem>>, vector<1x16xf32>
    %118 = vector.broadcast %117 : vector<1x16xf32> to vector<8x16xf32>
    %119 = arith.addf %116, %118 : vector<8x16xf32>
    %c0_64 = arith.constant 0 : index
    %c0_65 = arith.constant 0 : index
    %120 = vector.load %arg10[%c0_64, %c0_65] : memref<8x16xf32, #tpu.memory_space<vmem>>, vector<8x16xf32>
    tpu.vector_store %arg10[%c0_64, %c0_65], %119 {strides = array<i32>} : memref<8x16xf32, #tpu.memory_space<vmem>>, vector<8x16xf32>,
    return
  }
  func.func @transform_0(%arg0: i32) -> (i32, i32, i32) {
    %c0_i32 = arith.constant 0 : i32
    %c0_i32_0 = arith.constant 0 : i32
    %c0_i32_1 = arith.constant 0 : i32
    return %c0_i32, %arg0, %c0_i32_0 : i32, i32, i32
  }
  func.func @transform_1(%arg0: i32) -> (i32, i32) {
    %c0_i32 = arith.constant 0 : i32
    %c0_i32_0 = arith.constant 0 : i32
    %c0_i32_1 = arith.constant 0 : i32
    return %c0_i32, %c0_i32_0 : i32, i32
  }
  func.func @transform_2(%arg0: i32) -> (i32, i32) {
    %c0_i32 = arith.constant 0 : i32
    %c0_i32_0 = arith.constant 0 : i32
    %c0_i32_1 = arith.constant 0 : i32
    return %c0_i32, %c0_i32_0 : i32, i32
  }
  func.func @transform_3(%arg0: i32) -> (i32, i32, i32) {
    %c0_i32 = arith.constant 0 : i32
    %c0_i32_0 = arith.constant 0 : i32
    %c0_i32_1 = arith.constant 0 : i32
    %c0_i32_2 = arith.constant 0 : i32
    return %c0_i32, %c0_i32_0, %c0_i32_1 : i32, i32, i32
  }
  func.func @transform_4(%arg0: i32) -> (i32, i32) {
    %c0_i32 = arith.constant 0 : i32
    %c0_i32_0 = arith.constant 0 : i32
    %c0_i32_1 = arith.constant 0 : i32
    return %c0_i32, %c0_i32_0 : i32, i32
  }
  func.func @transform_5(%arg0: i32) -> (i32, i32, i32) {
    %c0_i32 = arith.constant 0 : i32
    %c0_i32_0 = arith.constant 0 : i32
    %c0_i32_1 = arith.constant 0 : i32
    %c0_i32_2 = arith.constant 0 : i32
    return %c0_i32, %c0_i32_0, %c0_i32_1 : i32, i32, i32
  }
  func.func @transform_6(%arg0: i32) -> (i32, i32) {
    %c0_i32 = arith.constant 0 : i32
    %c0_i32_0 = arith.constant 0 : i32
    %c0_i32_1 = arith.constant 0 : i32
    return %c0_i32, %c0_i32_0 : i32, i32
  }
  func.func @transform_7(%arg0: i32) -> (i32, i32, i32) {
    %c0_i32 = arith.constant 0 : i32
    %c0_i32_0 = arith.constant 0 : i32
    %c0_i32_1 = arith.constant 0 : i32
    %c0_i32_2 = arith.constant 0 : i32
    return %c0_i32, %c0_i32_0, %c0_i32_1 : i32, i32, i32
  }
  func.func @transform_8(%arg0: i32) -> (i32, i32) {
    %c0_i32 = arith.constant 0 : i32
    %c0_i32_0 = arith.constant 0 : i32
    %c0_i32_1 = arith.constant 0 : i32
    return %c0_i32, %c0_i32_0 : i32, i32
  }
  func.func @transform_9(%arg0: i32) -> (i32, i32) {
    %c0_i32 = arith.constant 0 : i32
    %c0_i32_0 = arith.constant 0 : i32
    return %arg0, %c0_i32 : i32, i32
  }
}

</mosaic_0001>

<bundles_post_ra>
// kernel: tpu_custom_call.1
= control target key start
LH: loop header
LB: loop body
LE: loop exit
PB: predicated region body
PF: predicated region fallthrough
CT: control target
= control target key end

     0   :  { %vm104_vm0 = vcmask 1043456   ;;  %vm55_vm1 = vcmask 97280   ;;  %s1476_s0 = inlined_call_operand.vmem [shape: f32[16,8,12], index: 0, kind: input, shape index: {}]   ;;  %s1477_s1 = inlined_call_operand.vmem [shape: f32[12,30], index: 1, kind: input, shape index: {}]   ;;  %s1478_s2 = inlined_call_operand.vmem [shape: f32[1,30], index: 2, kind: input, shape index: {}]   ;;  %s1479_s3 = inlined_call_operand.vmem [shape: f32[6,30,20], index: 3, kind: input, shape index: {}]   ;;  %s1480_s4 = inlined_call_operand.vmem [shape: f32[1,20], index: 4, kind: input, shape index: {}]   ;;  %s1481_s5 = inlined_call_operand.vmem [shape: f32[4,20,10], index: 5, kind: input, shape index: {}]   ;;  %s1482_s6 = inlined_call_operand.vmem [shape: f32[1,10], index: 6, kind: input, shape index: {}]   ;;  %s1483_s7 = inlined_call_operand.vmem [shape: f32[2,10,16], index: 7, kind: input, shape index: {}]   ;;  %s1484_s8 = inlined_call_operand.vmem [shape: f32[1,16], index: 8, kind: input, shape index: {}]   ;;  %s1485_s9 = inlined_call_operand.hbm [shape: f32[8,16], index: 9, kind: output, shape index: {}]  }
   0x1   :  { %v50_v0 = vld [vmem:[%s1477_s1 + $0x8] sm:$0xf]  ;;  %v49_v1 = vld [vmem:[%s1477_s1] sm:$0xff] }
   0x2   :  { %888 = vmatpush.msk.msra.mxu0 %vm104_vm0, %v50_v0  ;;  %v33_v2 = vld [vmem:[%s1476_s0] sm:$0xff] }
   0x4   :  { %123 = vmatpush.msra.mxu0 %v49_v1 }
   0x5   :  { %14 = vsyncpa [#allocation3], 0  ;;  %889 = vmatmul.msk.f32.vlgmr.msra.gmra.mxu0 %vm55_vm1, %v33_v2  ;;  %v34_v3 = vld [vmem:[%s1476_s0 + $0x8] sm:$0xff]  ;;  %v35_v4 = vld [vmem:[%s1476_s0 + $0x10] sm:$0xff]  ;;  %vm297_vm2 = vcmask 1045504   ;;  %vm278_vm3 = vcmask 244736  }
   0x6   :  { %v36_v5 = vld [vmem:[%s1476_s0 + $0x18] sm:$0xff]  ;;  %v37_v6 = vld [vmem:[%s1476_s0 + $0x20] sm:$0xff]  ;;  %v38_v7 = vld [vmem:[%s1476_s0 + $0x28] sm:$0xff]  ;;  %s1097_s11 = smov [#allocation2]   ;;  %s879_s15 = sshll.u32 %s1485_s9, 4  ;;  %s880_s15 = int_to_ptr.hbm [resolvable:$true] %s879_s15 }
   0x7   :  { %v39_v8 = vld [vmem:[%s1476_s0 + $0x30] sm:$0xff]  ;;  %v40_v9 = vld [vmem:[%s1476_s0 + $0x38] sm:$0xff]  ;;  %v41_v10 = vld [vmem:[%s1476_s0 + $0x40] sm:$0xff]  ;;  %s877_s12 = sshll.u32 %s1097_s11, 4  ;;  %s878_s12 = int_to_ptr.vmem [resolvable:$true] %s877_s12 }
   0x8   :  { %v42_v11 = vld [vmem:[%s1476_s0 + $0x48] sm:$0xff]  ;;  %v43_v12 = vld [vmem:[%s1476_s0 + $0x50] sm:$0xff]  ;;  %v44_v13 = vld [vmem:[%s1476_s0 + $0x58] sm:$0xff] }
   0x9   :  { %v45_v14 = vld [vmem:[%s1476_s0 + $0x60] sm:$0xff]  ;;  %v46_v15 = vld [vmem:[%s1476_s0 + $0x68] sm:$0xff]  ;;  %v272_v16 = vld [vmem:[%s1479_s3 + $0x18] sm:$0x3f] }
   0xa   :  { %932 = vmatpush.msk.msra.mxu2 %vm297_vm2, %v272_v16  ;;  %v271_v17 = vld [vmem:[%s1479_s3 + $0x10] sm:$0xff]  ;;  %v270_v18 = vld [vmem:[%s1479_s3 + $0x8] sm:$0xff]  ;;  %v269_v19 = vld [vmem:[%s1479_s3] sm:$0xff] }
   0xb   :  { %v47_v20 = vld [vmem:[%s1476_s0 + $0x70] sm:$0xff]  ;;  %v924_v21 = vld [vmem:[%s1479_s3 + $0x38] sm:$0x3f]  ;;  %v922_v23 = vld [vmem:[%s1479_s3 + $0x28] sm:$0xff] }
   0xc   :  { %370 = vmatpush.msra.mxu2 %v271_v17  ;;  %925 = vmatpush.msk.msra.mxu1 %vm297_vm2, %v924_v21  ;;  %v923_v22 = vld [vmem:[%s1479_s3 + $0x30] sm:$0xff]  ;;  %v921_v24 = vld [vmem:[%s1479_s3 + $0x20] sm:$0xff]  ;;  %v48_v25 = vld [vmem:[%s1476_s0 + $0x78] sm:$0xff] }
   0xd   :  { %890 = vmatmul.msk.f32.gmra.mxu0 %vm55_vm1, %v34_v3  ;;  %v942_v26 = vld [vmem:[%s1479_s3 + $0x58] sm:$0x3f]  ;;  %v941_v27 = vld [vmem:[%s1479_s3 + $0x50] sm:$0xff]  ;;  %v1255_v28 = vld [vmem:[%s1478_s2] ss:$0 sm:$0xff] }
   0xe   :  { %371 = vmatpush.msra.mxu2 %v270_v18  ;;  %314 = vmatpush.msra.mxu1 %v923_v22  ;;  %v940_v29 = vld [vmem:[%s1479_s3 + $0x48] sm:$0xff]  ;;  %v939_v30 = vld [vmem:[%s1479_s3 + $0x40] sm:$0xff]  ;;  %v964_v62 = vld [vmem:[%s1479_s3 + $0x98] sm:$0x3f] }
   0xf   :  { %943 = vmatpush.msk.msra.mxu3 %vm297_vm2, %v942_v26  ;;  %v974_v16 = vld [vmem:[%s1479_s3 + $0xb0] sm:$0xff] }
  0x10   :  { %372 = vmatpush.msra.mxu2 %v269_v19  ;;  %315 = vmatpush.msra.mxu1 %v922_v23  ;;  %v952_v17 = vld [vmem:[%s1479_s3 + $0x70] sm:$0xff] }
  0x11   :  { %416 = vmatpush.msra.mxu3 %v941_v27 }
  0x12   :  { %316 = vmatpush.msra.mxu1 %v921_v24  ;;  %965 = vmatpush.msk.msrb.mxu2 %vm297_vm2, %v964_v62 }
  0x13   :  { %417 = vmatpush.msra.mxu3 %v940_v29 }
  0x15   :  { %891 = vmatmul.msk.f32.gmra.mxu0 %vm55_vm1, %v35_v4  ;;  %418 = vmatpush.msra.mxu3 %v939_v30 }
  0x1d   :  { %892 = vmatmul.msk.f32.gmra.mxu0 %vm55_vm1, %v36_v5 }
  0x25   :  { %893 = vmatmul.msk.f32.gmra.mxu0 %vm55_vm1, %v37_v6  ;;  %v975_v6 = vld [vmem:[%s1479_s3 + $0xb8] sm:$0x3f] }
  0x26   :  { %976 = vmatpush.msk.msrb.mxu3 %vm297_vm2, %v975_v6 }
  0x28   :  { %572 = vmatpush.msrb.mxu3 %v974_v16 }
  0x2d   :  { %894 = vmatmul.msk.f32.gmra.mxu0 %vm55_vm1, %v38_v7  ;;  %v953_v7 = vld [vmem:[%s1479_s3 + $0x78] sm:$0x3f] }
  0x2e   :  { %954 = vmatpush.msk.msrb.mxu1 %vm297_vm2, %v953_v7 }
  0x30   :  { %468 = vmatpush.msrb.mxu1 %v952_v17 }
  0x35   :  { %895 = vmatmul.msk.f32.gmra.mxu0 %vm55_vm1, %v39_v8 }
  0x3d   :  { %896 = vmatmul.msk.f32.gmra.mxu0 %vm55_vm1, %v40_v9 }
  0x45   :  { %897 = vmatmul.msk.f32.gmra.mxu0 %vm55_vm1, %v41_v10 }
  0x4d   :  { %898 = vmatmul.msk.f32.gmra.mxu0 %vm55_vm1, %v42_v11 }
  0x55   :  { %899 = vmatmul.msk.f32.gmra.mxu0 %vm55_vm1, %v43_v12 }
  0x5d   :  { %900 = vmatmul.msk.f32.gmra.mxu0 %vm55_vm1, %v44_v13 }
  0x65   :  { %901 = vmatmul.msk.f32.gmra.mxu0 %vm55_vm1, %v45_v14 }
  0x6d   :  { %902 = vmatmul.msk.f32.gmra.mxu0 %vm55_vm1, %v46_v15  ;;  %v963_v15 = vld [vmem:[%s1479_s3 + $0x90] sm:$0xff] }
  0x6e   :  { %520 = vmatpush.msrb.mxu2 %v963_v15 }
  0x75   :  { %903 = vmatmul.msk.f32.gmra.mxu0 %vm55_vm1, %v47_v20 }
  0x7d   :  { %904 = vmatmul.msk.f32.gmra.mxu0 %vm55_vm1, %v48_v25  ;;  %v962_v25 = vld [vmem:[%s1479_s3 + $0x88] sm:$0xff] }
  0x7e   :  { %521 = vmatpush.msrb.mxu2 %v962_v25 }
  0x82   :  { %v125_v31 = vpop.f32.mrf.mxu0 }
  0x83   :  { %v126_v32 = vadd.f32 %v1255_v28, %v125_v31 }
  0x85   :  { %v189_v33 = vmin.f32 %v126_v32, 0.0  ;;  %vm173_vm4 = vcmp.gt.f32.partialorder %v126_v32, 0.0 }
  0x87   :  { %v205_v34 = vmul.f32 1.442695, %v189_v33 }
  0x89   :  { %1023 = vpow2.f32 %v205_v34  ;;  %v973_v34 = vld [vmem:[%s1479_s3 + $0xa8] sm:$0xff] }
  0x8a   :  { %v128_v35 = vpop.f32.mrf.mxu0  ;;  %573 = vmatpush.msrb.mxu3 %v973_v34 }
  0x8b   :  { %v129_v36 = vadd.f32 %v1255_v28, %v128_v35  ;;  %v951_v35 = vld [vmem:[%s1479_s3 + $0x68] sm:$0xff] }
  0x8c   :  { %469 = vmatpush.msrb.mxu1 %v951_v35  ;;  %v991_v35 = vld [vmem:[%s1481_s5 + $0x28] sm:$0xf] }
  0x8d   :  { %v190_v37 = vmin.f32 %v129_v36, 0.0  ;;  %vm174_vm5 = vcmp.gt.f32.partialorder %v129_v36, 0.0 }
  0x8f   :  { %v1024_v38 = vpop.eup %1023  ;;  %v207_v39 = vmul.f32 1.442695, %v190_v37 }
  0x90   :  { %v905_v40 = vadd.f32 -1.0, %v1024_v38 }
  0x91   :  { %1025 = vpow2.f32 %v207_v39 }
  0x92   :  { %v131_v41 = vpop.f32.mrf.mxu0  ;;  %v253_v42 = vsel %vm173_vm4, %v126_v32, %v905_v40  ;;  %v972_v40 = vld [vmem:[%s1479_s3 + $0xa0] sm:$0xff] }
  0x93   :  { %v132_v43 = vadd.f32 %v1255_v28, %v131_v41  ;;  %933 = vmatmul.msk.f32.vlgmr.msra.gmra.mxu2 %vm278_vm3, %v253_v42  ;;  %v950_v41 = vld [vmem:[%s1479_s3 + $0x60] sm:$0xff]  ;;  %574 = vmatpush.msrb.mxu3 %v972_v40 }
  0x94   :  { %470 = vmatpush.msrb.mxu1 %v950_v41  ;;  %v1000_v40 = vld [vmem:[%s1481_s5 + $0x40] sm:$0xf] }
  0x95   :  { %v191_v44 = vmin.f32 %v132_v43, 0.0  ;;  %vm175_vm6 = vcmp.gt.f32.partialorder %v132_v43, 0.0 }
  0x97   :  { %v1026_v45 = vpop.eup %1025  ;;  %v209_v46 = vmul.f32 1.442695, %v191_v44 }
  0x98   :  { %v906_v47 = vadd.f32 -1.0, %v1026_v45 }
  0x99   :  { %1027 = vpow2.f32 %v209_v46 }
  0x9a   :  { %v134_v48 = vpop.f32.mrf.mxu0  ;;  %v254_v49 = vsel %vm174_vm5, %v129_v36, %v906_v47  ;;  %v961_v36 = vld [vmem:[%s1479_s3 + $0x80] sm:$0xff] }
  0x9b   :  { %v135_v50 = vadd.f32 %v1255_v28, %v134_v48  ;;  %926 = vmatmul.msk.f32.vlgmr.msra.gmra.mxu1 %vm278_vm3, %v254_v49  ;;  %522 = vmatpush.msrb.mxu2 %v961_v36 }
  0x9c   :  { %992 = vmatpush.msk.msra.mxu1 %vm104_vm0, %v991_v35 }
  0x9d   :  { %v192_v51 = vmin.f32 %v135_v50, 0.0  ;;  %vm176_vm7 = vcmp.gt.f32.partialorder %v135_v50, 0.0 }
  0x9f   :  { %v1028_v52 = vpop.eup %1027  ;;  %v211_v53 = vmul.f32 1.442695, %v192_v51 }
  0xa0   :  { %v907_v54 = vadd.f32 -1.0, %v1028_v52 }
  0xa1   :  { %1029 = vpow2.f32 %v211_v53 }
  0xa2   :  { %v137_v55 = vpop.f32.mrf.mxu0  ;;  %v255_v56 = vsel %vm175_vm6, %v132_v43, %v907_v54 }
  0xa3   :  { %v138_v57 = vadd.f32 %v1255_v28, %v137_v55  ;;  %934 = vmatmul.msk.f32.gmra.mxu2 %vm278_vm3, %v255_v56  ;;  %944 = vmatmul.msk.f32.vlgmr.msra.gmra.mxu3 %vm278_vm3, %v255_v56 }
  0xa4   :  { %1001 = vmatpush.msk.msra.mxu3 %vm104_vm0, %v1000_v40 }
  0xa5   :  { %v193_v58 = vmin.f32 %v138_v57, 0.0  ;;  %vm177_vm8 = vcmp.gt.f32.partialorder %v138_v57, 0.0 }
  0xa7   :  { %v1030_v59 = vpop.eup %1029  ;;  %v213_v60 = vmul.f32 1.442695, %v193_v58 }
  0xa8   :  { %v908_v61 = vadd.f32 -1.0, %v1030_v59 }
  0xa9   :  { %1031 = vpow2.f32 %v213_v60 }
  0xaa   :  { %v140_v63 = vpop.f32.mrf.mxu0  ;;  %v1275_v0 = vsel %vm176_vm7, %v135_v50, %v908_v61 }
  0xab   :  { %v141_v1 = vadd.f32 %v1255_v28, %v140_v63  ;;  %927 = vmatmul.msk.f32.gmra.mxu1 %vm278_vm3, %v1275_v0 }
  0xad   :  { %v194_v2 = vmin.f32 %v141_v1, 0.0  ;;  %vm178_vm9 = vcmp.gt.f32.partialorder %v141_v1, 0.0 }
  0xaf   :  { %v1032_v3 = vpop.eup %1031  ;;  %v215_v4 = vmul.f32 1.442695, %v194_v2 }
  0xb0   :  { %v909_v5 = vadd.f32 -1.0, %v1032_v3 }
  0xb1   :  { %1033 = vpow2.f32 %v215_v4 }
  0xb2   :  { %v143_v8 = vpop.f32.mrf.mxu0  ;;  %v1287_v9 = vsel %vm177_vm8, %v138_v57, %v909_v5 }
  0xb3   :  { %v144_v10 = vadd.f32 %v1255_v28, %v143_v8  ;;  %935 = vmatmul.msk.f32.gmra.mxu2 %vm278_vm3, %v1287_v9  ;;  %945 = vmatmul.msk.f32.gmra.mxu3 %vm278_vm3, %v1287_v9 }
  0xb5   :  { %v195_v11 = vmin.f32 %v144_v10, 0.0  ;;  %vm179_vm10 = vcmp.gt.f32.partialorder %v144_v10, 0.0 }
  0xb7   :  { %v1034_v12 = vpop.eup %1033  ;;  %v217_v13 = vmul.f32 1.442695, %v195_v11 }
  0xb8   :  { %v910_v14 = vadd.f32 -1.0, %v1034_v12 }
  0xb9   :  { %1035 = vpow2.f32 %v217_v13 }
  0xba   :  { %v146_v18 = vpop.f32.mrf.mxu0  ;;  %v1305_v19 = vsel %vm178_vm9, %v141_v1, %v910_v14 }
  0xbb   :  { %v147_v20 = vadd.f32 %v1255_v28, %v146_v18  ;;  %928 = vmatmul.msk.f32.gmra.mxu1 %vm278_vm3, %v1305_v19 }
  0xbd   :  { %v196_v21 = vmin.f32 %v147_v20, 0.0  ;;  %vm180_vm11 = vcmp.gt.f32.partialorder %v147_v20, 0.0 }
  0xbf   :  { %v1036_v22 = vpop.eup %1035  ;;  %v219_v23 = vmul.f32 1.442695, %v196_v21 }
  0xc0   :  { %v911_v24 = vadd.f32 -1.0, %v1036_v22 }
  0xc1   :  { %1037 = vpow2.f32 %v219_v23 }
  0xc2   :  { %v149_v26 = vpop.f32.mrf.mxu0  ;;  %v1313_v27 = vsel %vm179_vm10, %v144_v10, %v911_v24 }
  0xc3   :  { %v150_v29 = vadd.f32 %v1255_v28, %v149_v26  ;;  %936 = vmatmul.msk.f32.gmra.mxu2 %vm278_vm3, %v1313_v27  ;;  %946 = vmatmul.msk.f32.gmra.mxu3 %vm278_vm3, %v1313_v27 }
  0xc5   :  { %v197_v30 = vmin.f32 %v150_v29, 0.0  ;;  %vm181_vm12 = vcmp.gt.f32.partialorder %v150_v29, 0.0 }
  0xc7   :  { %v1038_v31 = vpop.eup %1037  ;;  %v221_v32 = vmul.f32 1.442695, %v197_v30 }
  0xc8   :  { %v912_v33 = vadd.f32 -1.0, %v1038_v31 }
  0xc9   :  { %1039 = vpow2.f32 %v221_v32 }
  0xca   :  { %v152_v37 = vpop.f32.mrf.mxu0  ;;  %v1329_v38 = vsel %vm180_vm11, %v147_v20, %v912_v33  ;;  %vm815_vm11 = vcmask 1041408  }
  0xcb   :  { %v153_v39 = vadd.f32 %v1255_v28, %v152_v37  ;;  %929 = vmatmul.msk.f32.gmra.mxu1 %vm278_vm3, %v1329_v38  ;;  %v648_v37 = vld [vmem:[%s1481_s5 + $0x10] sm:$0xf] }
  0xcc   :  { %995 = vmatpush.msk.msra.mxu2 %vm104_vm0, %v648_v37 }
  0xcd   :  { %v198_v42 = vmin.f32 %v153_v39, 0.0  ;;  %vm182_vm13 = vcmp.gt.f32.partialorder %v153_v39, 0.0 }
  0xcf   :  { %v1040_v43 = vpop.eup %1039  ;;  %v223_v44 = vmul.f32 1.442695, %v198_v42 }
  0xd0   :  { %v913_v45 = vadd.f32 -1.0, %v1040_v43 }
  0xd1   :  { %1041 = vpow2.f32 %v223_v44 }
  0xd2   :  { %v155_v46 = vpop.f32.mrf.mxu0  ;;  %v261_v47 = vsel %vm181_vm12, %v150_v29, %v913_v45  ;;  %vm811_vm12 = vcmask 80896  }
  0xd3   :  { %v156_v48 = vadd.f32 %v1255_v28, %v155_v46  ;;  %937 = vmatmul.msk.f32.gmra.mxu2 %vm278_vm3, %v261_v47  ;;  %947 = vmatmul.msk.f32.gmra.mxu3 %vm278_vm3, %v261_v47 }
  0xd5   :  { %v199_v49 = vmin.f32 %v156_v48, 0.0  ;;  %vm183_vm14 = vcmp.gt.f32.partialorder %v156_v48, 0.0 }
  0xd7   :  { %v1042_v50 = vpop.eup %1041  ;;  %v225_v51 = vmul.f32 1.442695, %v199_v49  ;;  %v647_v49 = vld [vmem:[%s1481_s5 + $0x8] sm:$0xff] }
  0xd8   :  { %v914_v52 = vadd.f32 -1.0, %v1042_v50  ;;  %709 = vmatpush.msra.mxu2 %v647_v49 }
  0xd9   :  { %1043 = vpow2.f32 %v225_v51  ;;  %v646_v51 = vld [vmem:[%s1481_s5] sm:$0xff] }
  0xda   :  { %v158_v53 = vpop.f32.mrf.mxu0  ;;  %v262_v54 = vsel %vm182_vm13, %v153_v39, %v914_v52  ;;  %710 = vmatpush.msra.mxu2 %v646_v51 }
  0xdb   :  { %v159_v55 = vadd.f32 %v1255_v28, %v158_v53  ;;  %930 = vmatmul.msk.f32.gmra.mxu1 %vm278_vm3, %v262_v54 }
  0xdd   :  { %v200_v56 = vmin.f32 %v159_v55, 0.0  ;;  %vm184_vm15 = vcmp.gt.f32.partialorder %v159_v55, 0.0 }
  0xdf   :  { %v1044_v57 = vpop.eup %1043  ;;  %v227_v58 = vmul.f32 1.442695, %v200_v56  ;;  %v989_v56 = vld [vmem:[%s1481_s5 + $0x18] sm:$0xff] }
  0xe0   :  { %v915_v59 = vadd.f32 -1.0, %v1044_v57 }
  0xe1   :  { %1045 = vpow2.f32 %v227_v58 }
  0xe2   :  { %v161_v60 = vpop.f32.mrf.mxu0  ;;  %v263_v61 = vsel %vm183_vm14, %v156_v48, %v915_v59  ;;  %v990_v48 = vld [vmem:[%s1481_s5 + $0x20] sm:$0xff] }
  0xe3   :  { %v162_v62 = vadd.f32 %v1255_v28, %v161_v60  ;;  %938 = vmatmul.msk.f32.gmra.mxu2 %vm278_vm3, %v263_v61  ;;  %948 = vmatmul.msk.f32.gmra.mxu3 %vm278_vm3, %v263_v61 }
  0xe4   :  { %677 = vmatpush.msra.mxu1 %v990_v48 }
  0xe5   :  { %v201_v63 = vmin.f32 %v162_v62, 0.0  ;;  %vm185_vm1 = vcmp.gt.f32.partialorder %v162_v62, 0.0 }
  0xe6   :  { %678 = vmatpush.msra.mxu1 %v989_v56 }
  0xe7   :  { %v1046_v1 = vpop.eup %1045  ;;  %v229_v2 = vmul.f32 1.442695, %v201_v63  ;;  %v1420_v63 = vld [vmem:[%s1480_s4] ss:$0 sm:$0xff] }
  0xe8   :  { %v916_v3 = vadd.f32 -1.0, %v1046_v1  ;;  %v998_v1 = vld [vmem:[%s1481_s5 + $0x30] sm:$0xff] }
  0xe9   :  { %1047 = vpow2.f32 %v229_v2 }
  0xea   :  { %v264_v4 = vsel %vm184_vm15, %v159_v55, %v916_v3  ;;  %v164_v5 = vpop.f32.mrf.mxu0  ;;  %v999_v55 = vld [vmem:[%s1481_s5 + $0x38] sm:$0xff]  ;;  %vm870_vm15 = vcmask 130048  }
  0xeb   :  { %931 = vmatmul.msk.f32.gmra.mxu1 %vm278_vm3, %v264_v4  ;;  %966 = vmatmul.msk.f32.vlgmr.msrb.gmra.mxu2 %vm278_vm3, %v1287_v9  ;;  %v165_v12 = vadd.f32 %v1255_v28, %v164_v5 }
  0xec   :  { %742 = vmatpush.msra.mxu3 %v999_v55 }
  0xed   :  { %vm186_vm4 = vcmp.gt.f32.partialorder %v165_v12, 0.0 }
  0xee   :  { %743 = vmatpush.msra.mxu3 %v998_v1 }
  0xef   :  { %v1048_v6 = vpop.eup %1047 }
  0xf0   :  { %v917_v7 = vadd.f32 -1.0, %v1048_v6 }
  0xf2   :  { %v265_v8 = vsel %vm185_vm1, %v162_v62, %v917_v7  ;;  %v167_v10 = vpop.f32.mrf.mxu0 }
  0xf3   :  { %949 = vmatmul.msk.f32.gmra.mxu3 %vm278_vm3, %v265_v8  ;;  %955 = vmatmul.msk.f32.vlgmr.msrb.gmra.mxu1 %vm278_vm3, %v1275_v0  ;;  %v168_v11 = vadd.f32 %v1255_v28, %v167_v10  ;;  %v202_v0 = vmin.f32 %v165_v12, 0.0 }
  0xf4   :  { %967 = vmatmul.msk.f32.gmra.mxu2 %vm278_vm3, %v1313_v27 }
  0xf5   :  { %v203_v9 = vmin.f32 %v168_v11, 0.0  ;;  %v231_v15 = vmul.f32 1.442695, %v202_v0  ;;  %vm187_vm2 = vcmp.gt.f32.partialorder %v168_v11, 0.0 }
  0xf7   :  { %v233_v13 = vmul.f32 1.442695, %v203_v9 }
  0xf9   :  { %1049 = vpow2.f32 %v233_v13 }
  0xfa   :  { %v170_v14 = vpop.f32.mrf.mxu0  ;;  %1051 = vpow2.f32 %v231_v15 }
  0xfb   :  { %956 = vmatmul.msk.f32.gmra.mxu1 %vm278_vm3, %v1305_v19  ;;  %977 = vmatmul.msk.f32.vlgmr.msrb.gmra.mxu3 %vm278_vm3, %v1305_v19  ;;  %v171_v16 = vadd.f32 %v1255_v28, %v170_v14 }
  0xfc   :  { %968 = vmatmul.msk.f32.gmra.mxu2 %vm278_vm3, %v261_v47 }
  0xfd   :  { %v204_v18 = vmin.f32 %v171_v16, 0.0  ;;  %vm188_vm5 = vcmp.gt.f32.partialorder %v171_v16, 0.0 }
  0xff   :  { %v1050_v17 = vpop.eup %1049  ;;  %v235_v20 = vmul.f32 1.442695, %v204_v18 }
 0x100   :  { %v919_v19 = vadd.f32 -1.0, %v1050_v17  ;;  %v1052_v21 = vpop.eup %1051 }
 0x101   :  { %1053 = vpow2.f32 %v235_v20  ;;  %v918_v28 = vadd.f32 -1.0, %v1052_v21 }
 0x102   :  { %v267_v22 = vsel %vm187_vm2, %v168_v11, %v919_v19 }
 0x103   :  { %957 = vmatmul.msk.f32.gmra.mxu1 %vm278_vm3, %v1329_v38  ;;  %978 = vmatmul.msk.f32.gmra.mxu3 %vm278_vm3, %v1329_v38  ;;  %v266_v23 = vsel %vm186_vm4, %v165_v12, %v918_v28  ;;  %v1006_v12 = vld [vmem:[%s1481_s5 + $0x58] sm:$0xf] }
 0x104   :  { %969 = vmatmul.msk.f32.gmra.mxu2 %vm278_vm3, %v263_v61  ;;  %1007 = vmatpush.msk.msrb.mxu1 %vm104_vm0, %v1006_v12  ;;  %vm653_vm0 = vcmask 162816  }
 0x107   :  { %v1054_v24 = vpop.eup %1053 }
 0x108   :  { %v920_v25 = vadd.f32 -1.0, %v1054_v24  ;;  %v1004_v24 = vld [vmem:[%s1481_s5 + $0x48] sm:$0xff] }
 0x10a   :  { %v268_v26 = vsel %vm188_vm5, %v171_v16, %v920_v25 }
 0x10b   :  { %958 = vmatmul.msk.f32.gmra.mxu1 %vm278_vm3, %v262_v54  ;;  %979 = vmatmul.msk.f32.gmra.mxu3 %vm278_vm3, %v262_v54 }
 0x10c   :  { %970 = vmatmul.msk.f32.gmra.mxu2 %vm278_vm3, %v265_v8 }
 0x113   :  { %959 = vmatmul.msk.f32.gmra.mxu1 %vm278_vm3, %v264_v4  ;;  %980 = vmatmul.msk.f32.gmra.mxu3 %vm278_vm3, %v264_v4 }
 0x114   :  { %971 = vmatmul.msk.f32.gmra.mxu2 %vm278_vm3, %v267_v22 }
 0x116   :  { %v374_v27 = vpop.f32.mrf.mxu2 }
 0x118   :  { %v318_v29 = vpop.f32.mrf.mxu1 }
 0x119   :  { %v375_v53 = vadd.f32 %v374_v27, %v318_v29 }
 0x11b   :  { %960 = vmatmul.msk.f32.gmra.mxu1 %vm278_vm3, %v266_v23  ;;  %981 = vmatmul.msk.f32.gmra.mxu3 %vm278_vm3, %v266_v23  ;;  %v1005_v23 = vld [vmem:[%s1481_s5 + $0x50] sm:$0xff] }
 0x11c   :  { %777 = vmatpush.msrb.mxu1 %v1005_v23 }
 0x11e   :  { %778 = vmatpush.msrb.mxu1 %v1004_v24  ;;  %v1021_v24 = vld [vmem:[%s1482_s6] ss:$0 sm:$0xff] }
 0x123   :  { %982 = vmatmul.msk.f32.gmra.mxu3 %vm278_vm3, %v268_v26 }
 0x126   :  { %v377_v30 = vpop.f32.mrf.mxu2  ;;  %v420_v32 = vpop.f32.mrf.mxu3 }
 0x127   :  { %v438_v57 = vadd.f32 %v420_v32, %v375_v53 }
 0x128   :  { %v321_v31 = vpop.f32.mrf.mxu1 }
 0x129   :  { %v378_v61 = vadd.f32 %v377_v30, %v321_v31 }
 0x136   :  { %v380_v33 = vpop.f32.mrf.mxu2  ;;  %v423_v36 = vpop.f32.mrf.mxu3 }
 0x137   :  { %v439_v3 = vadd.f32 %v423_v36, %v378_v61 }
 0x138   :  { %v324_v34 = vpop.f32.mrf.mxu1 }
 0x139   :  { %v381_v10 = vadd.f32 %v380_v33, %v324_v34 }
 0x146   :  { %v383_v38 = vpop.f32.mrf.mxu2  ;;  %v426_v41 = vpop.f32.mrf.mxu3 }
 0x147   :  { %v440_v14 = vadd.f32 %v426_v41, %v381_v10 }
 0x148   :  { %v327_v39 = vpop.f32.mrf.mxu1 }
 0x149   :  { %v384_v21 = vadd.f32 %v383_v38, %v327_v39 }
 0x156   :  { %v1390_v42 = vpop.f32.mrf.mxu2  ;;  %v429_v44 = vpop.f32.mrf.mxu3 }
 0x157   :  { %v441_v27 = vadd.f32 %v429_v44, %v384_v21 }
 0x158   :  { %v1392_v43 = vpop.f32.mrf.mxu1 }
 0x159   :  { %v387_v37 = vadd.f32 %v1390_v42, %v1392_v43 }
 0x166   :  { %v1394_v45 = vpop.f32.mrf.mxu2  ;;  %v1398_v47 = vpop.f32.mrf.mxu3 }
 0x167   :  { %v442_v44 = vadd.f32 %v1398_v47, %v387_v37 }
 0x168   :  { %v1396_v46 = vpop.f32.mrf.mxu1 }
 0x169   :  { %v390_v42 = vadd.f32 %v1394_v45, %v1396_v46 }
 0x16e   :  { %v524_v52 = vpop.f32.mrf.mxu2 }
 0x170   :  { %v472_v50 = vpop.f32.mrf.mxu1 }
 0x171   :  { %v490_v59 = vadd.f32 %v472_v50, %v438_v57 }
 0x173   :  { %v542_v62 = vadd.f32 %v524_v52, %v490_v59 }
 0x176   :  { %v1409_v54 = vpop.f32.mrf.mxu3 }
 0x177   :  { %v527_v60 = vpop.f32.mrf.mxu2  ;;  %v443_v59 = vadd.f32 %v1409_v54, %v390_v42 }
 0x178   :  { %v475_v58 = vpop.f32.mrf.mxu1 }
 0x179   :  { %v491_v6 = vadd.f32 %v475_v58, %v439_v3 }
 0x17b   :  { %v543_v9 = vadd.f32 %v527_v60, %v491_v6 }
 0x17e   :  { %v576_v2 = vpop.f32.mrf.mxu3 }
 0x17f   :  { %v594_v4 = vadd.f32 %v576_v2, %v542_v62  ;;  %v530_v13 = vpop.f32.mrf.mxu2 }
 0x180   :  { %v478_v5 = vpop.f32.mrf.mxu1 }
 0x181   :  { %v604_v7 = vadd.f32 %v1420_v63, %v594_v4  ;;  %v492_v16 = vadd.f32 %v478_v5, %v440_v14 }
 0x183   :  { %v616_v8 = vmin.f32 %v604_v7, 0.0  ;;  %v544_v28 = vadd.f32 %v530_v13, %v492_v16  ;;  %vm610_vm3 = vcmp.gt.f32.partialorder %v604_v7, 0.0  ;;  %v807_v16 = vld [vmem:[%s1483_s7 + $0x8] sm:$0x3] }
 0x184   :  { %1016 = vmatpush.msk.msrb.mxu3 %vm815_vm11, %v807_v16 }
 0x185   :  { %v622_v11 = vmul.f32 1.442695, %v616_v8 }
 0x186   :  { %v579_v0 = vpop.f32.mrf.mxu3 }
 0x187   :  { %1055 = vpow2.f32 %v622_v11  ;;  %v595_v15 = vadd.f32 %v579_v0, %v543_v9  ;;  %v533_v30 = vpop.f32.mrf.mxu2 }
 0x188   :  { %v481_v18 = vpop.f32.mrf.mxu1 }
 0x189   :  { %v605_v17 = vadd.f32 %v1420_v63, %v595_v15  ;;  %v493_v32 = vadd.f32 %v481_v18, %v441_v27 }
 0x18b   :  { %v617_v19 = vmin.f32 %v605_v17, 0.0  ;;  %v545_v39 = vadd.f32 %v533_v30, %v493_v32  ;;  %vm611_vm6 = vcmp.gt.f32.partialorder %v605_v17, 0.0 }
 0x18d   :  { %v1056_v20 = vpop.eup %1055  ;;  %v624_v22 = vmul.f32 1.442695, %v617_v19  ;;  %v1013_v19 = vld [vmem:[%s1483_s7 + $0x18] sm:$0x3] }
 0x18e   :  { %v983_v25 = vadd.f32 -1.0, %v1056_v20  ;;  %v582_v26 = vpop.f32.mrf.mxu3  ;;  %v1012_v20 = vld [vmem:[%s1483_s7 + $0x10] sm:$0xff]  ;;  %1014 = vmatpush.msk.msrb.mxu2 %vm815_vm11, %v1013_v19 }
 0x18f   :  { %1057 = vpow2.f32 %v624_v22  ;;  %v596_v29 = vadd.f32 %v582_v26, %v544_v28  ;;  %v536_v52 = vpop.f32.mrf.mxu2 }
 0x190   :  { %v640_v31 = vsel %vm610_vm3, %v604_v7, %v983_v25  ;;  %v484_v35 = vpop.f32.mrf.mxu1  ;;  %834 = vmatpush.msrb.mxu2 %v1012_v20 }
 0x191   :  { %v606_v33 = vadd.f32 %v1420_v63, %v596_v29  ;;  %996 = vmatmul.msk.f32.vlgmr.msra.gmra.mxu2 %vm653_vm0, %v640_v31  ;;  %v494_v50 = vadd.f32 %v484_v35, %v442_v44 }
 0x193   :  { %v618_v34 = vmin.f32 %v606_v33, 0.0  ;;  %v546_v56 = vadd.f32 %v536_v52, %v494_v50  ;;  %vm612_vm7 = vcmp.gt.f32.partialorder %v606_v33, 0.0 }
 0x195   :  { %v1058_v36 = vpop.eup %1057  ;;  %v626_v38 = vmul.f32 1.442695, %v618_v34 }
 0x196   :  { %v984_v40 = vadd.f32 -1.0, %v1058_v36  ;;  %v585_v41 = vpop.f32.mrf.mxu3 }
 0x197   :  { %v597_v48 = vadd.f32 %v585_v41, %v545_v39  ;;  %1059 = vpow2.f32 %v626_v38  ;;  %v539_v45 = vpop.f32.mrf.mxu2 }
 0x198   :  { %v641_v49 = vsel %vm611_vm6, %v605_v17, %v984_v40  ;;  %v487_v57 = vpop.f32.mrf.mxu1  ;;  %v806_v17 = vld [vmem:[%s1483_s7] sm:$0xff] }
 0x199   :  { %v607_v51 = vadd.f32 %v1420_v63, %v597_v48  ;;  %993 = vmatmul.msk.f32.vlgmr.msra.gmra.mxu1 %vm653_vm0, %v641_v49  ;;  %v495_v62 = vadd.f32 %v487_v57, %v443_v59  ;;  %860 = vmatpush.msrb.mxu3 %v806_v17 }
 0x19b   :  { %v619_v53 = vmin.f32 %v607_v51, 0.0  ;;  %v547_v4 = vadd.f32 %v539_v45, %v495_v62  ;;  %vm613_vm8 = vcmp.gt.f32.partialorder %v607_v51, 0.0 }
 0x19d   :  { %v1060_v55 = vpop.eup %1059  ;;  %v628_v43 = vmul.f32 1.442695, %v619_v53 }
 0x19e   :  { %v588_v58 = vpop.f32.mrf.mxu3  ;;  %v985_v47 = vadd.f32 -1.0, %v1060_v55 }
 0x19f   :  { %v598_v60 = vadd.f32 %v588_v58, %v546_v56  ;;  %1061 = vpow2.f32 %v628_v43 }
 0x1a0   :  { %v642_v61 = vsel %vm612_vm7, %v606_v33, %v985_v47 }
 0x1a1   :  { %v608_v1 = vadd.f32 %v1420_v63, %v598_v60  ;;  %997 = vmatmul.msk.f32.gmra.mxu2 %vm653_vm0, %v642_v61  ;;  %1002 = vmatmul.msk.f32.vlgmr.msra.gmra.mxu3 %vm653_vm0, %v642_v61 }
 0x1a3   :  { %v620_v2 = vmin.f32 %v608_v1, 0.0  ;;  %vm614_vm9 = vcmp.gt.f32.partialorder %v608_v1, 0.0 }
 0x1a5   :  { %v1062_v46 = vpop.eup %1061  ;;  %v630_v3 = vmul.f32 1.442695, %v620_v2 }
 0x1a6   :  { %v591_v5 = vpop.f32.mrf.mxu3  ;;  %v986_v6 = vadd.f32 -1.0, %v1062_v46 }
 0x1a7   :  { %v599_v7 = vadd.f32 %v591_v5, %v547_v4  ;;  %1063 = vpow2.f32 %v630_v3 }
 0x1a8   :  { %v643_v54 = vsel %vm613_vm8, %v607_v51, %v986_v6  ;;  %v1022_v51 = vld [vmem:[%s1484_s8] ss:$0 sm:$0xff] }
 0x1a9   :  { %v609_v8 = vadd.f32 %v1420_v63, %v599_v7  ;;  %994 = vmatmul.msk.f32.gmra.mxu1 %vm653_vm0, %v643_v54 }
 0x1ab   :  { %v621_v10 = vmin.f32 %v609_v8, 0.0  ;;  %vm615_vm10 = vcmp.gt.f32.partialorder %v609_v8, 0.0 }
 0x1ad   :  { %v1064_v11 = vpop.eup %1063  ;;  %v632_v9 = vmul.f32 1.442695, %v621_v10 }
 0x1ae   :  { %v987_v12 = vadd.f32 -1.0, %v1064_v11 }
 0x1af   :  { %1065 = vpow2.f32 %v632_v9 }
 0x1b0   :  { %v644_v13 = vsel %vm614_vm9, %v608_v1, %v987_v12 }
 0x1b1   :  { %1003 = vmatmul.msk.f32.gmra.mxu3 %vm653_vm0, %v644_v13  ;;  %1008 = vmatmul.msk.f32.vlgmr.msrb.gmra.mxu1 %vm653_vm0, %v643_v54 }
 0x1b5   :  { %v1066_v0 = vpop.eup %1065 }
 0x1b6   :  { %v988_v14 = vadd.f32 -1.0, %v1066_v0 }
 0x1b8   :  { %v645_v15 = vsel %vm615_vm10, %v609_v8, %v988_v14 }
 0x1b9   :  { %1009 = vmatmul.msk.f32.gmra.mxu1 %vm653_vm0, %v645_v15 }
 0x214   :  { %v712_v21 = vpop.f32.mrf.mxu2 }
 0x216   :  { %v680_v63 = vpop.f32.mrf.mxu1 }
 0x217   :  { %v713_v28 = vadd.f32 %v712_v21, %v680_v63 }
 0x224   :  { %v745_v22 = vpop.f32.mrf.mxu3  ;;  %v715_v29 = vpop.f32.mrf.mxu2 }
 0x225   :  { %v751_v23 = vadd.f32 %v745_v22, %v713_v28 }
 0x226   :  { %v683_v18 = vpop.f32.mrf.mxu1 }
 0x227   :  { %v716_v30 = vadd.f32 %v715_v29, %v683_v18 }
 0x22e   :  { %v780_v25 = vpop.f32.mrf.mxu1 }
 0x22f   :  { %v786_v26 = vadd.f32 %v780_v25, %v751_v23 }
 0x231   :  { %v792_v27 = vadd.f32 %v1021_v24, %v786_v26 }
 0x233   :  { %v796_v31 = vmin.f32 %v792_v27, 0.0  ;;  %vm794_vm13 = vcmp.gt.f32.partialorder %v792_v27, 0.0 }
 0x234   :  { %v748_v32 = vpop.f32.mrf.mxu3 }
 0x235   :  { %v798_v33 = vmul.f32 1.442695, %v796_v31  ;;  %v752_v34 = vadd.f32 %v748_v32, %v716_v30 }
 0x236   :  { %v783_v35 = vpop.f32.mrf.mxu1 }
 0x237   :  { %1067 = vpow2.f32 %v798_v33  ;;  %v787_v36 = vadd.f32 %v783_v35, %v752_v34 }
 0x239   :  { %v793_v37 = vadd.f32 %v1021_v24, %v787_v36 }
 0x23b   :  { %v797_v38 = vmin.f32 %v793_v37, 0.0  ;;  %vm795_vm14 = vcmp.gt.f32.partialorder %v793_v37, 0.0 }
 0x23d   :  { %v1068_v39 = vpop.eup %1067  ;;  %v800_v40 = vmul.f32 1.442695, %v797_v38 }
 0x23e   :  { %v1010_v41 = vadd.f32 -1.0, %v1068_v39 }
 0x23f   :  { %1069 = vpow2.f32 %v800_v40 }
 0x240   :  { %v804_v44 = vsel %vm794_vm13, %v792_v27, %v1010_v41 }
 0x241   :  { %1017 = vmatmul.msk.f32.vlgmr.msrb.gmra.mxu3 %vm811_vm12, %v804_v44 }
 0x245   :  { %v1070_v48 = vpop.eup %1069 }
 0x246   :  { %v1011_v49 = vadd.f32 -1.0, %v1070_v48 }
 0x248   :  { %v805_v50 = vsel %vm795_vm14, %v793_v37, %v1011_v49 }
 0x249   :  { %1015 = vmatmul.msk.f32.vlgmr.msrb.gmra.mxu2 %vm811_vm12, %v805_v50 }
 0x2c4   :  { %v862_v52 = vpop.f32.mrf.mxu3 }
 0x2cc   :  { %v836_v53 = vpop.f32.mrf.mxu2 }
 0x2cd   :  { %v863_v55 = vadd.f32 %v862_v52, %v836_v53 }
 0x2cf   :  { %v869_v42 = vadd.f32 %v1022_v51, %v863_v55 }
 0x2d1   :  { %871 = vst.msk [vmem:[#allocation2] sm:$0xff] %vm870_vm15, %v869_v42 }
 0x2d2   :  { %882 = dma.vmem_to_hbm [thread:$0]  %s878_s12, 128, %s880_s15, [#allocation3]  }
 0x2d3   :  { %1095 = dma.done.wait [#allocation3], 128  }
 0x2d4   :  { %1096 = vsyncadd [#allocation3], 4294967168 }
 0x2d5   :  { %887 = vsyncpa [#allocation3], 1 }

</bundles_post_ra>
